<compile_context>
chip_gen: v7x
topology: tpu7x:2x2x1
jax: 0.10.0
libtpu: 0.0.40
codegen_flags: <defaults>
</compile_context>

<pallas_src>
import jax
import jax.numpy as jnp
from jax.experimental import pallas as pl
from jax.experimental.pallas import tpu as pltpu


def _round_up(a, m):
    return ((a + m - 1) // m) * m


def policy_kernel(x_ref, w1_ref, b1_ref, w2_ref, b2_ref, w3_ref, b3_ref, out_ref):
    w1 = w1_ref[...]
    w2 = w2_ref[...]
    w3 = w3_ref[...]

    # fc1 + ReLU  (matmul operands in the weights' dtype, f32 accumulation)
    x = x_ref[...].astype(w1.dtype)
    h1 = jnp.dot(x, w1, preferred_element_type=jnp.float32) + b1_ref[...]
    h1 = jnp.maximum(h1, 0.0)

    # fc2 + ReLU
    h2 = jnp.dot(h1.astype(w2.dtype), w2, preferred_element_type=jnp.float32) + b2_ref[...]
    h2 = jnp.maximum(h2, 0.0)

    # fc3 (padded action columns carry a -1e30 bias -> exp() underflows to 0)
    logits = jnp.dot(h2.astype(w3.dtype), w3, preferred_element_type=jnp.float32) + b3_ref[...]

    # numerically-stable softmax over the full (lane-dense, padded) action dim
    m = jnp.max(logits, axis=-1, keepdims=True)
    e = jnp.exp(logits - m)
    s = jnp.sum(e, axis=-1, keepdims=True)
    inv = pl.reciprocal(s, approx=True)        # EUP slot (free here)
    inv = inv * (2.0 - s * inv)                # one Newton step -> ~f32 accuracy
    out_ref[...] = (e * inv).astype(out_ref.dtype)


def policy_network_forward(x, params, *, batch_tile=256, use_bf16=False):
    """x: (B, state_dim) float32. params: dict of weights/biases. Returns (B, action_dim)."""
    w1, b1, w2, b2, w3, b3 = (
        params["w1"], params["b1"], params["w2"], params["b2"], params["w3"], params["b3"]
    )
    B, state_dim = x.shape
    hidden = w1.shape[1]
    action_dim = w3.shape[1]
    out_dtype = x.dtype

    # ---- lane-dense output: pad the action dim up to a multiple of 128 ----
    padded_actions = _round_up(action_dim, 128)
    pad_a = padded_actions - action_dim
    if pad_a:
        w3p = jnp.pad(w3, ((0, 0), (0, pad_a)))                              # zero columns
        b3p = jnp.pad(b3, ((0, 0), (0, pad_a)), constant_values=-1e30)       # kill padded logits
    else:
        w3p, b3p = w3, b3

    # ---- optional bf16 matmul operands (f32 accumulate, f32 biases/epilogue) ----
    if use_bf16:
        x_in = x.astype(jnp.bfloat16)
        w1m = w1.astype(jnp.bfloat16)
        w2m = w2.astype(jnp.bfloat16)
        w3m = w3p.astype(jnp.bfloat16)
    else:
        x_in, w1m, w2m, w3m = x, w1, w2, w3p

    # ---- batch tiling ----
    TB = min(batch_tile, _round_up(B, 8))
    Bp = _round_up(B, TB)
    if Bp != B:
        x_in = jnp.pad(x_in, ((0, Bp - B), (0, 0)))
    grid = (Bp // TB,)

    const = lambda i: (0, 0)  # weights/biases stay VMEM-resident across the batch grid

    out_padded = pl.pallas_call(
        policy_kernel,
        out_shape=jax.ShapeDtypeStruct((Bp, padded_actions), out_dtype),
        grid=grid,
        in_specs=[
            pl.BlockSpec((TB, state_dim), lambda i: (i, 0)),
            pl.BlockSpec((state_dim, hidden), const),
            pl.BlockSpec((1, hidden), const),
            pl.BlockSpec((hidden, hidden), const),
            pl.BlockSpec((1, hidden), const),
            pl.BlockSpec((hidden, padded_actions), const),
            pl.BlockSpec((1, padded_actions), const),
        ],
        out_specs=pl.BlockSpec((TB, padded_actions), lambda i: (i, 0)),
        compiler_params=pltpu.CompilerParams(dimension_semantics=("parallel",)),
    )(x_in, w1m, b1, w2m, b2, w3m, b3p)

    return out_padded[:B, :action_dim]


def init_params(key, state_dim, action_dim, hidden_size=128, dtype=jnp.float32):
    """Deterministic init mimicking PyTorch nn.Linear default (uniform +-1/sqrt(fan_in))."""
    def linear_init(k, fan_in, fan_out):
        kw, kb = jax.random.split(k)
        bound = 1.0 / jnp.sqrt(fan_in)
        w = jax.random.uniform(kw, (fan_in, fan_out), dtype, -bound, bound)
        b = jax.random.uniform(kb, (1, fan_out), dtype, -bound, bound)
        return w, b

    k1, k2, k3 = jax.random.split(key, 3)
    w1, b1 = linear_init(k1, state_dim, hidden_size)
    w2, b2 = linear_init(k2, hidden_size, hidden_size)
    w3, b3 = linear_init(k3, hidden_size, action_dim)
    return {"w1": w1, "b1": b1, "w2": w2, "b2": b2, "w3": w3, "b3": b3}


def reference_forward(x, params):
    h1 = jnp.maximum(x @ params["w1"] + params["b1"], 0.0)
    h2 = jnp.maximum(h1 @ params["w2"] + params["b2"], 0.0)
    logits = h2 @ params["w3"] + params["b3"]
    return jax.nn.softmax(logits, axis=-1)


if __name__ == "__main__":
    key = jax.random.PRNGKey(0)
    k_params, k_x = jax.random.split(key)

    B, state_dim, action_dim, hidden = 64, 16, 8, 128
    params = init_params(k_params, state_dim, action_dim, hidden)
    x = jax.random.normal(k_x, (B, state_dim), dtype=jnp.float32)

    ref = reference_forward(x, params)

    # f32 path (batch_tile=32 -> grid of 2 tiles) — exact vs reference
    out = policy_network_forward(x, params, batch_tile=32)
    out = jax.block_until_ready(out)
    assert out.shape == (B, action_dim)
    assert jnp.allclose(out, ref, atol=1e-5, rtol=1e-5), "mismatch vs reference (f32)"
    assert jnp.allclose(jnp.sum(out, axis=-1), 1.0, atol=1e-5), "softmax rows must sum to 1"

    # bf16 matmul-operand path (v6e/v7x MXU fast path) — f32 accumulation keeps it close
    out_bf16 = jax.block_until_ready(
        policy_network_forward(x, params, batch_tile=32, use_bf16=True)
    )
    assert out_bf16.shape == (B, action_dim)
    assert jnp.allclose(jnp.sum(out_bf16, axis=-1), 1.0, atol=1e-3), "bf16 softmax rows must sum to 1"
    assert jnp.allclose(out_bf16, ref, atol=5e-2), "bf16 path diverged too far from reference"

    print("KERNEL_OK")
</pallas_src>

<mosaic_0001>
module attributes {stable_mosaic.version = 11 : i64} {
  func.func @policy_kernel(%arg0: i32, %arg1: memref<32x16xf32, #tpu.memory_space<vmem>>, %arg2: memref<16x128xf32, #tpu.memory_space<vmem>>, %arg3: memref<1x128xf32, #tpu.memory_space<vmem>>, %arg4: memref<128x128xf32, #tpu.memory_space<vmem>>, %arg5: memref<1x128xf32, #tpu.memory_space<vmem>>, %arg6: memref<128x128xf32, #tpu.memory_space<vmem>>, %arg7: memref<1x128xf32, #tpu.memory_space<vmem>>, %arg8: memref<32x128xf32, #tpu.memory_space<vmem>>) attributes {dimension_semantics = [#tpu.dimension_semantics<parallel>], iteration_bounds = array<i64: 2>, scalar_prefetch = 0 : i64, scratch_operands = 0 : i64, tpu.core_type = #tpu.core_type<tc>, window_params = [{transform_indices = @transform_0, window_bounds = array<i64: 32, 16>}, {pipeline_mode = #tpu.pipeline_mode<synchronous>, transform_indices = @transform_1, window_bounds = array<i64: 16, 128>}, {pipeline_mode = #tpu.pipeline_mode<synchronous>, transform_indices = @transform_2, window_bounds = array<i64: 1, 128>}, {pipeline_mode = #tpu.pipeline_mode<synchronous>, transform_indices = @transform_3, window_bounds = array<i64: 128, 128>}, {pipeline_mode = #tpu.pipeline_mode<synchronous>, transform_indices = @transform_4, window_bounds = array<i64: 1, 128>}, {pipeline_mode = #tpu.pipeline_mode<synchronous>, transform_indices = @transform_5, window_bounds = array<i64: 128, 128>}, {pipeline_mode = #tpu.pipeline_mode<synchronous>, transform_indices = @transform_6, window_bounds = array<i64: 1, 128>}, {transform_indices = @transform_7, window_bounds = array<i64: 32, 128>}]} {
    %c0 = arith.constant 0 : index
    %c0_0 = arith.constant 0 : index
    %0 = vector.load %arg2[%c0, %c0_0] : memref<16x128xf32, #tpu.memory_space<vmem>>, vector<16x128xf32>
    %c0_1 = arith.constant 0 : index
    %c0_2 = arith.constant 0 : index
    %1 = vector.load %arg4[%c0_1, %c0_2] : memref<128x128xf32, #tpu.memory_space<vmem>>, vector<128x128xf32>
    %c0_3 = arith.constant 0 : index
    %c0_4 = arith.constant 0 : index
    %2 = vector.load %arg6[%c0_3, %c0_4] : memref<128x128xf32, #tpu.memory_space<vmem>>, vector<128x128xf32>
    %c0_5 = arith.constant 0 : index
    %c0_6 = arith.constant 0 : index
    %3 = vector.load %arg1[%c0_5, %c0_6] : memref<32x16xf32, #tpu.memory_space<vmem>>, vector<32x16xf32>
    %cst = arith.constant dense<0.000000e+00> : vector<32x128xf32>
    %4 = tpu.matmul %3, %0, %cst {dimension_numbers = #tpu.dot_dimension_numbers<[1], [0], [0], [1], [0, 0, 1, 1], [], []>} : vector<32x16xf32>, vector<16x128xf32>, vector<32x128xf32> -> vector<32x128xf32>
    %c0_7 = arith.constant 0 : index
    %c0_8 = arith.constant 0 : index
    %5 = vector.load %arg3[%c0_7, %c0_8] : memref<1x128xf32, #tpu.memory_space<vmem>>, vector<1x128xf32>
    %6 = vector.broadcast %5 : vector<1x128xf32> to vector<32x128xf32>
    %7 = arith.addf %4, %6 : vector<32x128xf32>
    %cst_9 = arith.constant 0.000000e+00 : f32
    %8 = vector.broadcast %cst_9 : f32 to vector<32x128xf32>
    %9 = arith.maximumf %7, %8 : vector<32x128xf32>
    %cst_10 = arith.constant dense<0.000000e+00> : vector<32x128xf32>
    %10 = tpu.matmul %9, %1, %cst_10 {dimension_numbers = #tpu.dot_dimension_numbers<[1], [0], [0], [1], [0, 0, 1, 1], [], []>} : vector<32x128xf32>, vector<128x128xf32>, vector<32x128xf32> -> vector<32x128xf32>
    %c0_11 = arith.constant 0 : index
    %c0_12 = arith.constant 0 : index
    %11 = vector.load %arg5[%c0_11, %c0_12] : memref<1x128xf32, #tpu.memory_space<vmem>>, vector<1x128xf32>
    %12 = vector.broadcast %11 : vector<1x128xf32> to vector<32x128xf32>
    %13 = arith.addf %10, %12 : vector<32x128xf32>
    %cst_13 = arith.constant 0.000000e+00 : f32
    %14 = vector.broadcast %cst_13 : f32 to vector<32x128xf32>
    %15 = arith.maximumf %13, %14 : vector<32x128xf32>
    %cst_14 = arith.constant dense<0.000000e+00> : vector<32x128xf32>
    %16 = tpu.matmul %15, %2, %cst_14 {dimension_numbers = #tpu.dot_dimension_numbers<[1], [0], [0], [1], [0, 0, 1, 1], [], []>} : vector<32x128xf32>, vector<128x128xf32>, vector<32x128xf32> -> vector<32x128xf32>
    %c0_15 = arith.constant 0 : index
    %c0_16 = arith.constant 0 : index
    %17 = vector.load %arg7[%c0_15, %c0_16] : memref<1x128xf32, #tpu.memory_space<vmem>>, vector<1x128xf32>
    %18 = vector.broadcast %17 : vector<1x128xf32> to vector<32x128xf32>
    %19 = arith.addf %16, %18 : vector<32x128xf32>
    %cst_17 = arith.constant dense<0xFF800000> : vector<32xf32>
    %20 = vector.multi_reduction <maximumf>, %19, %cst_17 [1] : vector<32x128xf32> to vector<32xf32>
    %21 = vector.shape_cast %20 : vector<32xf32> to vector<32x1xf32>
    %22 = vector.broadcast %21 : vector<32x1xf32> to vector<32x128xf32>
    %23 = arith.subf %19, %22 : vector<32x128xf32>
    %24 = math.exp %23 : vector<32x128xf32>
    %cst_18 = arith.constant dense<0.000000e+00> : vector<32xf32>
    %25 = vector.multi_reduction <add>, %24, %cst_18 [1] : vector<32x128xf32> to vector<32xf32>
    %26 = vector.shape_cast %25 : vector<32xf32> to vector<32x1xf32>
    %27 = tpu.reciprocal %26 {approx = true} : vector<32x1xf32> -> vector<32x1xf32>
    %28 = arith.mulf %26, %27 : vector<32x1xf32>
    %cst_19 = arith.constant 2.000000e+00 : f32
    %29 = vector.broadcast %cst_19 : f32 to vector<32x1xf32>
    %30 = arith.subf %29, %28 : vector<32x1xf32>
    %31 = arith.mulf %27, %30 : vector<32x1xf32>
    %32 = vector.broadcast %31 : vector<32x1xf32> to vector<32x128xf32>
    %33 = arith.mulf %24, %32 : vector<32x128xf32>
    %c0_20 = arith.constant 0 : index
    %c0_21 = arith.constant 0 : index
    %34 = vector.load %arg8[%c0_20, %c0_21] : memref<32x128xf32, #tpu.memory_space<vmem>>, vector<32x128xf32>
    tpu.vector_store %arg8[%c0_20, %c0_21], %33 {strides = array<i32>} : memref<32x128xf32, #tpu.memory_space<vmem>>, vector<32x128xf32>,
    return
  }
  func.func @transform_0(%arg0: i32) -> (i32, i32) {
    %c0_i32 = arith.constant 0 : i32
    %c0_i32_0 = arith.constant 0 : i32
    return %arg0, %c0_i32 : i32, i32
  }
  func.func @transform_1(%arg0: i32) -> (i32, i32) {
    %c0_i32 = arith.constant 0 : i32
    %c0_i32_0 = arith.constant 0 : i32
    %c0_i32_1 = arith.constant 0 : i32
    return %c0_i32, %c0_i32_0 : i32, i32
  }
  func.func @transform_2(%arg0: i32) -> (i32, i32) {
    %c0_i32 = arith.constant 0 : i32
    %c0_i32_0 = arith.constant 0 : i32
    %c0_i32_1 = arith.constant 0 : i32
    return %c0_i32, %c0_i32_0 : i32, i32
  }
  func.func @transform_3(%arg0: i32) -> (i32, i32) {
    %c0_i32 = arith.constant 0 : i32
    %c0_i32_0 = arith.constant 0 : i32
    %c0_i32_1 = arith.constant 0 : i32
    return %c0_i32, %c0_i32_0 : i32, i32
  }
  func.func @transform_4(%arg0: i32) -> (i32, i32) {
    %c0_i32 = arith.constant 0 : i32
    %c0_i32_0 = arith.constant 0 : i32
    %c0_i32_1 = arith.constant 0 : i32
    return %c0_i32, %c0_i32_0 : i32, i32
  }
  func.func @transform_5(%arg0: i32) -> (i32, i32) {
    %c0_i32 = arith.constant 0 : i32
    %c0_i32_0 = arith.constant 0 : i32
    %c0_i32_1 = arith.constant 0 : i32
    return %c0_i32, %c0_i32_0 : i32, i32
  }
  func.func @transform_6(%arg0: i32) -> (i32, i32) {
    %c0_i32 = arith.constant 0 : i32
    %c0_i32_0 = arith.constant 0 : i32
    %c0_i32_1 = arith.constant 0 : i32
    return %c0_i32, %c0_i32_0 : i32, i32
  }
  func.func @transform_7(%arg0: i32) -> (i32, i32) {
    %c0_i32 = arith.constant 0 : i32
    %c0_i32_0 = arith.constant 0 : i32
    return %arg0, %c0_i32 : i32, i32
  }
}

</mosaic_0001>

<bundles_post_ra>
// kernel: tpu_custom_call.1
= control target key start
LH: loop header
LB: loop body
LE: loop exit
PB: predicated region body
PF: predicated region fallthrough
CT: control target
= control target key end

     0   :  { %12 = vsyncpa [#allocation3], 0  ;;  %s1471_s0 = inlined_call_operand.vmem [shape: f32[64,16], index: 0, kind: input, shape index: {}]   ;;  %s1472_s1 = inlined_call_operand.vmem [shape: f32[16,128], index: 1, kind: input, shape index: {}]   ;;  %s1473_s2 = inlined_call_operand.vmem [shape: f32[1,128], index: 2, kind: input, shape index: {}]   ;;  %s1474_s3 = inlined_call_operand.hbm [shape: f32[128,128], index: 3, kind: input, shape index: {}]   ;;  %s1475_s4 = inlined_call_operand.vmem [shape: f32[1,128], index: 4, kind: input, shape index: {}]   ;;  %s1476_s5 = inlined_call_operand.hbm [shape: f32[128,128], index: 5, kind: input, shape index: {}]   ;;  %s1477_s6 = inlined_call_operand.vmem [shape: f32[1,128], index: 6, kind: input, shape index: {}]   ;;  %s1478_s7 = inlined_call_operand.hbm [shape: f32[64,128], index: 7, kind: output, shape index: {}]  }
   0x1   :  { %13 = vsyncpa [#allocation6], 0 }
   0x2   :  { %14 = vsyncpa [#allocation4], 0 }
   0x3   :  { %16 = vsyncpa [#allocation4 + $0x1], 0  ;;  %s1274_s24 = smov 0   ;;  %s1276_s25 = smov 0  }
   0x4   :  { %s1278_s26 = smov 0   ;;  %s1280_s27 = smov 0  }
   0x5 LB: > { %s1295_s28 = sadd.s32 4294967295, %s1225_s27   ;;  %s795_s29 = sadd.s32 4294967294, %s1225_s27   ;;  %s1225_s27 = sphi %s1280_s27, %s1498_s27   ;;  %s1221_s26 = sphi %s1278_s26, %s1497_s26   ;;  %s1217_s25 = sphi %s1276_s25, %s1496_s25   ;;  %s1213_s24 = sphi %s1274_s24, %s1495_s24  }
   0x6   : > { %s1299_s30 = sadd.s32 1, %s1225_s27   ;;  %s181_s8 = sadd.s32 1, %s1221_s26 }
   0x7   : > { %s178_s9 = ssub.s32 %s1225_s27, %s1299_s30  ;;  %p191_p0 = scmp.ne.s32.totalorder %s1221_s26, %s1217_s25 }
   0x8   : > { %p179_p1 = scmp.eq.s32.totalorder %s178_s9, 0  ;;  %p192_p2 = scmp.eq.s32.totalorder %s1295_s28, 1 }
   0x9   : > { %p197_p3 = scmp.ne.s32.totalorder %s1217_s25, %s1213_s24  ;;  %p198_p4 = scmp.eq.s32.totalorder %s795_s29, 1 }
   0xa   : > { %s1310_s10 = scalar_select %p179_p1, %s1221_s26, %s181_s8  }
   0xb   : > { %p1312_p5 = por %p192_p2, %p191_p0  ;;  %p1316_p6 = por %p198_p4, %p197_p3 }
   0xc   : > { %1482 = sst [smem:[#allocation11_spill]] %s1310_s10  ;;  %p796_p7 = scmp.ge.s32.totalorder %s1225_s27, 1 }
   0xd   : > { %s1483_s11 = scalar_select %p1312_p5, 1, 0 }
   0xe   : > { %s1484_s12 = scalar_select %p1316_p6, 1, 0 }
   0xf   : > { %p205_p8 = scmp.lt.s32.totalorder %s1225_s27, 3  ;;  %p1479_p9 = scmp.eq.s32.totalorder %s1295_s28, 0 }
  0x10   : > { %s1227_s14 = smov [#allocation2]   ;;  %s1228_s17 = smov [#allocation5]  }
  0x11   : > { %p1323_p10 = pnand %p796_p7, %p205_p8  ;;  %s223_s15 = sshll.u32 %s1227_s14, 4  ;;  %s224_s15 = int_to_ptr.vmem [resolvable:$true] %s223_s15 }
  0x12   : > { %s239_s18 = sshll.u32 %s1228_s17, 4  ;;  %s1099_s21 = scalar_lea.hbm %s1474_s3, 2048  ;;  %s1335_s18 = int_to_ptr.vmem [resolvable:$true] %s239_s18 }
  0x13   : > { %s1485_s13 = scalar_select %p1323_p10, 1, 0 }
  0x14   : > { %p1029_p11 = pneg %p1323_p10  ;;  %p1100_p13 = scmp.ne.s32.totalorder %s1474_s3, %s1099_s21 }
  0x15   : > { %p1106_p3 = scmp.lt.u32.totalorder %s1099_s21, %s1474_s3 }
  0x16   : > { %p1331_p12 = pnand %p1479_p9, %p1029_p11 }
  0x18   : > { %p1101_p0 = pneg %p1331_p12 }
  0x1a   : > { %p1102_p1 = pnand %p1101_p0, %p1100_p13 }
  0x1c   : > { %p1103_p2 = pneg %p1102_p1 }
  0x1e   : > { %p1108_p4 = pnand %p1106_p3, %p1103_p2 }
  0x20   : > { %1111 = shalt.err (!%p1108_p4)
}
  0x21   : > { %s1112_s9 = scalar_lea.vmem %s224_s15, 2048  ;;  %p1120_p9 = scmp.lt.s32.totalorder %s224_s15, %s224_s15 }
  0x22   : > { %p1113_p7 = scmp.ne.s32.totalorder %s224_s15, %s1112_s9  ;;  %p1121_p6 = scmp.lt.s32.totalorder %s1112_s9, %s1112_s9 }
  0x24   : > { %p1115_p8 = pnand %p1113_p7, %p1101_p0  ;;  %p1122_p5 = por %p1121_p6, %p1120_p9 }
  0x26   : > { %p1116_p11 = pneg %p1115_p8 }
  0x28   : > { %p1123_p10 = pnand %p1122_p5, %p1116_p11 }
  0x2a   : > { %1126 = shalt.err (!%p1123_p10)
}
  0x2b   : > { %s1229_s14 = smov 128   ;;  %s1230_s17 = smov 8  }
  0x2c   : > { %1032 = dma.hbm_to_vmem [thread:$0]  (!%p1331_p12), %s1474_s3, 2048, %s224_s15, [#allocation3], %s1229_s14, %s1229_s14, %s1230_s17  }
  0x2d   : > { %s1127_s23 = scalar_lea.hbm %s1476_s5, 2048 }
  0x2e   : > { %p1128_p13 = scmp.ne.s32.totalorder %s1476_s5, %s1127_s23  ;;  %p1134_p9 = scmp.lt.u32.totalorder %s1127_s23, %s1476_s5 }
  0x30   : > { %p1130_p5 = pnand %p1128_p13, %p1101_p0 }
  0x32   : > { %p1131_p6 = pneg %p1130_p5 }
  0x34   : > { %p1136_p10 = pnand %p1134_p9, %p1131_p6 }
  0x36   : > { %1139 = shalt.err (!%p1136_p10)
}
  0x37   : > { %s1140_s15 = scalar_lea.vmem %s1335_s18, 2048  ;;  %p1148_p4 = scmp.lt.s32.totalorder %s1335_s18, %s1335_s18 }
  0x38   : > { %p1141_p1 = scmp.ne.s32.totalorder %s1335_s18, %s1140_s15  ;;  %p1149_p7 = scmp.lt.s32.totalorder %s1140_s15, %s1140_s15 }
  0x3a   : > { %p1143_p2 = pnand %p1141_p1, %p1101_p0  ;;  %p1150_p8 = por %p1149_p7, %p1148_p4 }
  0x3c   : > { %p1144_p3 = pneg %p1143_p2 }
  0x3e   : > { %p1151_p11 = pnand %p1150_p8, %p1144_p3 }
  0x40   : > { %1154 = shalt.err (!%p1151_p11)
}
  0x41   : > { %1035 = dma.hbm_to_vmem [thread:$0]  (!%p1331_p12), %s1476_s5, 2048, %s1335_s18, [#allocation6], %s1229_s14, %s1229_s14, %s1230_s17  }
  0x42   : > { %p1487_p13 = scmp.ne.s32.totalorder %s1485_s13, 0 }
  0x43   : > { %p1488_p5 = scmp.eq.s32.totalorder (!%p1487_p13), %s1295_s28, 0 }
  0x44   : > { %267 = sbr.rel (%p1487_p13) target bundleno = 1081 (0x439), region = 48 }
  0x4b   : > { %1200 = dma.done.wait (%p1488_p5), [#allocation3], 2048   ;;  %p1489_p0 = pmov %p1488_p5 }
  0x4d   : > { %1202 = vsyncadd (%p1489_p0), [#allocation3], 4294965248  ;;  %p1490_p6 = pmov %p1489_p0 }
  0x4e   : > { %p1491_p9 = pmov %p1489_p0 }
  0x4f   : > { %1204 = dma.done.wait (%p1490_p6), [#allocation6], 2048  }
  0x50   : > { %1206 = vsyncadd (%p1491_p9), [#allocation6], 4294965248  ;;  %s804_s16 = sshll.u32 %s1295_s28, 2  ;;  %vm355_vm0 = vcmask 130048   ;;  %v310_v0 = vld [vmem:[%s1472_s1] sm:$0xff]  ;;  %v311_v1 = vld [vmem:[%s1472_s1 + $0x8] sm:$0xff] }
  0x51   : > { %p304_p10 = scmp.lt.s32.totalorder %s804_s16, 7  ;;  %v951_v3 = vpack.c.bf16 %v311_v1, %v310_v0  ;;  %v312_v4 = vld [vmem:[#allocation2] sm:$0xff]  ;;  %v313_v5 = vld [vmem:[#allocation2 + $0x8] sm:$0xff]  ;;  %v314_v6 = vld [vmem:[#allocation2 + $0x10] sm:$0xff]  ;;  %p1492_p1 = scmp.ne.s32.totalorder %s1483_s11, 0 }
  0x52   : > { %v955_v7 = vpack.c.bf16 %v313_v5, %v312_v4  ;;  %v315_v8 = vld [vmem:[#allocation2 + $0x18] sm:$0xff]  ;;  %v316_v11 = vld [vmem:[#allocation2 + $0x20] sm:$0xff]  ;;  %v317_v12 = vld [vmem:[#allocation2 + $0x28] sm:$0xff] }
  0x53   : > { %s1500_s16 = smov (!%p304_p10, %s804_s16), 7  ;;  %952 = vmatprep.subr.bf16.mxu0 %v951_v3  ;;  %v959_v10 = vpack.c.bf16 %v315_v8, %v314_v6  ;;  %v963_v14 = vpack.c.bf16 %v317_v12, %v316_v11  ;;  %v318_v16 = vld [vmem:[#allocation2 + $0x30] sm:$0xff]  ;;  %v319_v17 = vld [vmem:[#allocation2 + $0x38] sm:$0xff]  ;;  %v320_v19 = vld [vmem:[#allocation2 + $0x40] sm:$0xff] }
  0x54   : > { %s805_s18 = sshll.u32 %s1500_s16, 3  ;;  %954 = vmatpush3.bf16.msra.mxu0 %v951_v3  ;;  %956 = vmatprep.subr.bf16.mxu1 %v955_v7  ;;  %v967_v18 = vpack.c.bf16 %v319_v17, %v318_v16  ;;  %v321_v20 = vld [vmem:[#allocation2 + $0x48] sm:$0xff]  ;;  %v322_v22 = vld [vmem:[#allocation2 + $0x50] sm:$0xff]  ;;  %v323_v23 = vld [vmem:[#allocation2 + $0x58] sm:$0xff]  ;;  %s300_s16 = sand.u32 1, %s1217_s25  }
  0x55   : > { %s307_s17 = scalar_lea.vmem %s1471_s0, %s805_s18  ;;  %958 = vmatpush3.bf16.msra.mxu1 %v955_v7  ;;  %v971_v21 = vpack.c.bf16 %v321_v20, %v320_v19  ;;  %v975_v24 = vpack.c.bf16 %v323_v23, %v322_v22  ;;  %v324_v25 = vld [vmem:[#allocation2 + $0x60] sm:$0xff]  ;;  %v325_v26 = vld [vmem:[#allocation2 + $0x68] sm:$0xff]  ;;  %v326_v28 = vld [vmem:[#allocation2 + $0x70] sm:$0xff]  ;;  %s803_s18 = sshll.u32 %s300_s16, 5 }
  0x56   : > { %v344_v2 = vld [vmem:[%s307_s17] sm:$0xff]  ;;  %v345_v9 = vld [vmem:[%s307_s17 + $0x8] sm:$0xff]  ;;  %v346_v13 = vld [vmem:[%s307_s17 + $0x10] sm:$0xff]  ;;  %960 = vmatprep.subr.bf16.mxu1 %v959_v10  ;;  %v979_v27 = vpack.c.bf16 %v325_v26, %v324_v25  ;;  %s302_s13 = scalar_lea.vmem [#allocation7], %s803_s18  ;;  %s1430_s23 = scalar_lea.sflag [#allocation4], %s300_s16 }
  0x57   : > { %869 = vmatprep.mubr.msk.f32.mxu0 %vm355_vm0, %v344_v2  ;;  %v347_v15 = vld [vmem:[%s307_s17 + $0x18] sm:$0xff]  ;;  %v328_v31 = vld [vmem:[#allocation5] sm:$0xff]  ;;  %v329_v32 = vld [vmem:[#allocation5 + $0x8] sm:$0xff]  ;;  %s711_s14 = sshll.u32 %s302_s13, 4  ;;  %s818_s17 = sshll.u32 %s1295_s28, 9  ;;  %s1421_s14 = int_to_ptr.vmem [resolvable:$true] %s711_s14 }
  0x58   : > { %870 = vmatmul.mubr.msk.f32.vlgmr.msra.gmra.mrb[0].mxu0 %vm355_vm0, %v345_v9  ;;  %v327_v29 = vld [vmem:[#allocation2 + $0x78] sm:$0xff]  ;;  %v330_v33 = vld [vmem:[#allocation5 + $0x10] sm:$0xff]  ;;  %v987_v34 = vpack.c.bf16 %v329_v32, %v328_v31  ;;  %v332_v37 = vld [vmem:[#allocation5 + $0x20] sm:$0xff]  ;;  %s1426_s22 = scalar_lea.hbm %s1478_s7, %s818_s17  ;;  %s1155_s29 = scalar_lea.vmem %s1421_s14, 512 }
  0x59   : > { %872 = vmatprep.mubr.msk.f32.mxu0 %vm355_vm0, %v346_v13  ;;  %962 = vmatpush3.bf16.msra.mxu1 %v959_v10  ;;  %v983_v30 = vpack.c.bf16 %v327_v29, %v326_v28  ;;  %v331_v35 = vld [vmem:[#allocation5 + $0x18] sm:$0xff]  ;;  %v333_v38 = vld [vmem:[#allocation5 + $0x28] sm:$0xff]  ;;  %v334_v40 = vld [vmem:[#allocation5 + $0x30] sm:$0xff]  ;;  %p1156_p12 = scmp.ne.s32.totalorder %s1421_s14, %s1155_s29  ;;  %s1231_s28 = smov [#allocation7]  }
  0x5a   : > { %964 = vmatprep.subr.bf16.mxu1 %v963_v14  ;;  %v991_v36 = vpack.c.bf16 %v331_v35, %v330_v33  ;;  %988 = vmatprep.subr.bf16.mxu0 %v987_v34  ;;  %v995_v39 = vpack.c.bf16 %v333_v38, %v332_v37  ;;  %v335_v41 = vld [vmem:[#allocation5 + $0x38] sm:$0xff]  ;;  %v336_v43 = vld [vmem:[#allocation5 + $0x40] sm:$0xff]  ;;  %v337_v44 = vld [vmem:[#allocation5 + $0x48] sm:$0xff]  ;;  %s1159_s8 = sshll.u32 %s1231_s28, 4  ;;  %s1160_s8 = int_to_ptr.vmem [resolvable:$false] %s1159_s8 }
  0x5b   : > { %990 = vmatpush3.bf16.msra.mxu0 %v987_v34  ;;  %v999_v42 = vpack.c.bf16 %v335_v41, %v334_v40  ;;  %v1003_v45 = vpack.c.bf16 %v337_v44, %v336_v43  ;;  %v338_v46 = vld [vmem:[#allocation5 + $0x50] sm:$0xff]  ;;  %v339_v47 = vld [vmem:[#allocation5 + $0x58] sm:$0xff]  ;;  %v340_v49 = vld [vmem:[#allocation5 + $0x60] sm:$0xff]  ;;  %p1157_p2 = pnand %p1156_p12, %p1492_p1  ;;  %s1161_s9 = scalar_lea.vmem %s1160_s8, 1024 }
  0x5c   : > { %873 = vmatmul.mubr.msk.f32.gmra.mrb[2].mxu0 %vm355_vm0, %v347_v15  ;;  %992 = vmatprep.subr.bf16.mxu0 %v991_v36  ;;  %v1007_v48 = vpack.c.bf16 %v339_v47, %v338_v46  ;;  %v341_v50 = vld [vmem:[#allocation5 + $0x68] sm:$0xff]  ;;  %v806_v52 = vld [vmem:[%s1473_s2] ss:$0 sm:$0xff]  ;;  %v342_v1 = vld [vmem:[#allocation5 + $0x70] sm:$0xff]  ;;  %p1162_p4 = scmp.lt.s32.totalorder %s1421_s14, %s1160_s8  ;;  %p1163_p7 = scmp.lt.s32.totalorder %s1161_s9, %s1155_s29 }
  0x5d   : > { %966 = vmatpush3.bf16.msra.mxu1 %v963_v14  ;;  %v1011_v51 = vpack.c.bf16 %v341_v50, %v340_v49  ;;  %v343_v2 = vld [vmem:[#allocation5 + $0x78] sm:$0xff]  ;;  %v811_v4 = vld [vmem:[%s1475_s4] ss:$0 sm:$0xff]  ;;  %p1158_p3 = pneg %p1157_p2 }
  0x5e   : > { %968 = vmatprep.subr.bf16.mxu1 %v967_v18  ;;  %v1015_v3 = vpack.c.bf16 %v343_v2, %v342_v1  ;;  %v812_v17 = vld [vmem:[%s1477_s6] ss:$0 sm:$0xff]  ;;  %p1164_p8 = por %p1163_p7, %p1162_p4 }
  0x5f   : > { %994 = vmatpush3.bf16.msra.mxu0 %v991_v36 }
  0x60   : > { %996 = vmatprep.subr.bf16.mxu0 %v995_v39  ;;  %p1165_p11 = pnand %p1164_p8, %p1158_p3 }
  0x61   : > { %970 = vmatpush3.bf16.msra.mxu1 %v967_v18 }
  0x62   : > { %972 = vmatprep.subr.bf16.mxu1 %v971_v21 }
  0x63   : > { %998 = vmatpush3.bf16.msra.mxu0 %v995_v39 }
  0x64   : > { %1000 = vmatprep.subr.bf16.mxu0 %v999_v42 }
  0x65   : > { %974 = vmatpush3.bf16.msra.mxu1 %v971_v21 }
  0x66   : > { %976 = vmatprep.subr.bf16.mxu1 %v975_v24 }
  0x67   : > { %1002 = vmatpush3.bf16.msra.mxu0 %v999_v42 }
  0x68   : > { %1004 = vmatprep.subr.bf16.mxu0 %v1003_v45 }
  0x69   : > { %978 = vmatpush3.bf16.msra.mxu1 %v975_v24 }
  0x6a   : > { %980 = vmatprep.subr.bf16.mxu1 %v979_v27 }
  0x6b   : > { %1006 = vmatpush3.bf16.msra.mxu0 %v1003_v45 }
  0x6c   : > { %1008 = vmatprep.subr.bf16.mxu0 %v1007_v48 }
  0x6d   : > { %982 = vmatpush3.bf16.msra.mxu1 %v979_v27 }
  0x6e   : > { %984 = vmatprep.subr.bf16.mxu1 %v983_v30 }
  0x6f   : > { %1010 = vmatpush3.bf16.msra.mxu0 %v1007_v48 }
  0x70   : > { %1012 = vmatprep.subr.bf16.mxu0 %v1011_v51 }
  0x71   : > { %986 = vmatpush3.bf16.msra.mxu1 %v983_v30 }
  0x73   : > { %1014 = vmatpush3.bf16.msra.mxu0 %v1011_v51 }
  0x74   : > { %1016 = vmatprep.subr.bf16.mxu0 %v1015_v3 }
  0x77   : > { %1018 = vmatpush3.bf16.msra.mxu0 %v1015_v3 }
 0x12b   : > { %v871_v53 = vpop.f32.mrb[0].mxu0 }
 0x12c   : > { %v440_v54 = vadd.f32 %v871_v53, %v806_v52  ;;  %v434_v55 = vpop.f32.mrb[1].mxu0 }
 0x12d   : > { %v435_v56 = vadd.f32 %v806_v52, %v434_v55 }
 0x12e   : > { %v454_v59 = vmax.f32 %v440_v54, 0.0 }
 0x12f   : > { %v874_v57 = vpop.f32.mrb[2].mxu0  ;;  %v453_v58 = vmax.f32 %v435_v56, 0.0 }
 0x130   : > { %v450_v60 = vadd.f32 %v874_v57, %v806_v52  ;;  %v444_v61 = vpop.f32.mrb[3].mxu0 }
 0x131   : > { %v445_v62 = vadd.f32 %v806_v52, %v444_v61  ;;  %907 = vmatprep.mubr.f32.mxu1 %v453_v58 }
 0x132   : > { %908 = vmatmul.mubr.f32.vlgmr.msra.gmra.mrb[0].mxu1 %v454_v59  ;;  %v456_v0 = vmax.f32 %v450_v60, 0.0 }
 0x133   : > { %v455_v63 = vmax.f32 %v445_v62, 0.0 }
 0x135   : > { %910 = vmatprep.mubr.f32.mxu1 %v455_v63 }
 0x136   : > { %911 = vmatmul.mubr.f32.gmra.mrb[2].mxu1 %v456_v0 }
 0x205   : > { %v909_v5 = vpop.f32.mrb[0].mxu1 }
 0x206   : > { %v536_v6 = vadd.f32 %v909_v5, %v811_v4  ;;  %v530_v7 = vpop.f32.mrb[1].mxu1 }
 0x207   : > { %v531_v8 = vadd.f32 %v811_v4, %v530_v7 }
 0x208   : > { %v550_v11 = vmax.f32 %v536_v6, 0.0 }
 0x209   : > { %v549_v9 = vmax.f32 %v531_v8, 0.0  ;;  %v912_v10 = vpop.f32.mrb[2].mxu1 }
 0x20a   : > { %v546_v12 = vadd.f32 %v912_v10, %v811_v4  ;;  %v540_v13 = vpop.f32.mrb[3].mxu1 }
 0x20b   : > { %v541_v14 = vadd.f32 %v811_v4, %v540_v13  ;;  %945 = vmatprep.mubr.f32.mxu0 %v549_v9 }
 0x20c   : > { %946 = vmatmul.mubr.f32.vlgmr.msra.gmra.mrb[4].mxu0 %v550_v11  ;;  %v552_v16 = vmax.f32 %v546_v12, 0.0 }
 0x20d   : > { %v551_v15 = vmax.f32 %v541_v14, 0.0 }
 0x20f   : > { %948 = vmatprep.mubr.f32.mxu0 %v551_v15 }
 0x210   : > { %949 = vmatmul.mubr.f32.gmra.mrb[6].mxu0 %v552_v16 }
 0x2df   : > { %v947_v18 = vpop.f32.mrb[4].mxu0 }
 0x2e0   : > { %v626_v19 = vpop.f32.mrb[5].mxu0  ;;  %v632_v23 = vadd.f32 %v947_v18, %v812_v17 }
 0x2e1   : > { %v627_v20 = vadd.f32 %v812_v17, %v626_v19 }
 0x2e3   : > { %v950_v21 = vpop.f32.mrb[6].mxu0  ;;  %645 = vmax.xlane.f32.xlu0 %v627_v20 }
 0x2e4   : > { %v636_v22 = vpop.f32.mrb[7].mxu0  ;;  %v642_v25 = vadd.f32 %v950_v21, %v812_v17 }
 0x2e5   : > { %v637_v24 = vadd.f32 %v812_v17, %v636_v22 }
 0x2e7   : > { %649 = vmax.xlane.f32.xlu1 %v637_v24  ;;  %647 = vmax.xlane.f32.xlu0 %v632_v23 }
 0x2eb   : > { %651 = vmax.xlane.f32.xlu1 %v642_v25 }
 0x370   : > { %v646_v26 = vpop.xlane.xlu0 %645 }
 0x371   : > { %v653_v27 = vsub.f32 %v627_v20, %v646_v26 }
 0x373   : > { %v657_v28 = vmul.f32 1.442695, %v653_v27 }
 0x374   : > { %v650_v29 = vpop.xlane.xlu1 %649  ;;  %v648_v30 = vpop.xlane.xlu0 %647 }
 0x375   : > { %1083 = vpow2.f32 %v657_v28  ;;  %v655_v31 = vsub.f32 %v637_v24, %v650_v29  ;;  %v654_v32 = vsub.f32 %v632_v23, %v648_v30 }
 0x377   : > { %v661_v33 = vmul.f32 1.442695, %v655_v31  ;;  %v659_v34 = vmul.f32 1.442695, %v654_v32 }
 0x378   : > { %v652_v35 = vpop.xlane.xlu1 %651 }
 0x379   : > { %1085 = vpow2.f32 %v661_v33  ;;  %v656_v36 = vsub.f32 %v642_v25, %v652_v35 }
 0x37a   : > { %1087 = vpow2.f32 %v659_v34 }
 0x37b   : > { %v663_v37 = vmul.f32 1.442695, %v656_v36 }
 0x37d   : > { %1089 = vpow2.f32 %v663_v37 }
 0x37f   : > { %v1084_v38 = vpop.eup %1083 }
 0x380   : > { %665 = vadd.xlane.f32.xlu0 %v1084_v38 }
 0x383   : > { %v1086_v39 = vpop.eup %1085 }
 0x384   : > { %v1088_v40 = vpop.eup %1087  ;;  %669 = vadd.xlane.f32.xlu0 %v1086_v39 }
 0x385   : > { %667 = vadd.xlane.f32.xlu1 %v1088_v40 }
 0x387   : > { %v1090_v41 = vpop.eup %1089 }
 0x389   : > { %671 = vadd.xlane.f32.xlu1 %v1090_v41 }
 0x40d   : > { %v666_v42 = vpop.xlane.xlu0 %665 }
 0x40e   : > { %1091 = vrcp.f32 %v666_v42 }
 0x411   : > { %v670_v43 = vpop.xlane.xlu0 %669 }
 0x412   : > { %v668_v44 = vpop.xlane.xlu1 %667  ;;  %1093 = vrcp.f32 %v670_v43 }
 0x413   : > { %1095 = vrcp.f32 %v668_v44 }
 0x416   : > { %v672_v45 = vpop.xlane.xlu1 %671 }
 0x417   : > { %1097 = vrcp.f32 %v672_v45 }
 0x418   : > { %v1092_v46 = vpop.eup %1091 }
 0x419   : > { %v677_v47 = vmul.f32 %v1092_v46, %v666_v42 }
 0x41b   : > { %v681_v48 = vsub.f32 2.0, %v677_v47 }
 0x41c   : > { %v1094_v49 = vpop.eup %1093 }
 0x41d   : > { %v1096_v50 = vpop.eup %1095  ;;  %v685_v51 = vmul.f32 %v1092_v46, %v681_v48  ;;  %v679_v52 = vmul.f32 %v1094_v49, %v670_v43 }
 0x41e   : > { %v678_v53 = vmul.f32 %v1096_v50, %v668_v44 }
 0x41f   : > { %v689_v54 = vmul.f32 %v1084_v38, %v685_v51  ;;  %v683_v55 = vsub.f32 2.0, %v679_v52 }
 0x420   : > { %v682_v56 = vsub.f32 2.0, %v678_v53 }
 0x421   : > { %v1098_v57 = vpop.eup %1097  ;;  %693 = vst [vmem:[%s302_s13] sm:$0xff] %v689_v54  ;;  %v687_v58 = vmul.f32 %v1094_v49, %v683_v55 }
 0x422   : > { %v686_v59 = vmul.f32 %v1096_v50, %v682_v56  ;;  %v680_v60 = vmul.f32 %v1098_v57, %v672_v45 }
 0x423   : > { %v691_v61 = vmul.f32 %v1086_v39, %v687_v58 }
 0x424   : > { %v690_v62 = vmul.f32 %v1088_v40, %v686_v59  ;;  %v684_v63 = vsub.f32 2.0, %v680_v60 }
 0x425   : > { %695 = vst [vmem:[%s302_s13 + $0x10] sm:$0xff] %v691_v61 }
 0x426   : > { %694 = vst [vmem:[%s302_s13 + $0x8] sm:$0xff] %v690_v62  ;;  %v688_v0 = vmul.f32 %v1098_v57, %v684_v63 }
 0x428   : > { %v692_v1 = vmul.f32 %v1090_v41, %v688_v0 }
 0x42a   : > { %696 = vst [vmem:[%s302_s13 + $0x18] sm:$0xff] %v692_v1 }
 0x42b   : > { %1168 = shalt.err (!%p1165_p11)
}
 0x42c   : > { %s1169_s15 = scalar_lea.hbm %s1426_s22, 512  ;;  %s1173_s16 = scalar_lea.hbm %s1478_s7, 1024 }
 0x42d   : > { %p1170_p13 = scmp.ne.s32.totalorder %s1426_s22, %s1169_s15  ;;  %p1174_p6 = scmp.lt.u32.totalorder %s1426_s22, %s1478_s7 }
 0x42e   : > { %p1175_p9 = scmp.lt.u32.totalorder %s1173_s16, %s1169_s15  ;;  %p1177_p12 = scmp.lt.u32.totalorder %s1169_s15, %s1426_s22 }
 0x42f   : > { %p1171_p5 = pnand %p1170_p13, %p1492_p1 }
 0x430   : > { %p1176_p10 = por %p1175_p9, %p1174_p6 }
 0x431   : > { %p1172_p0 = pneg %p1171_p5 }
 0x432   : > { %p1178_p2 = por %p1177_p12, %p1176_p10 }
 0x434   : > { %p1179_p3 = pnand %p1178_p2, %p1172_p0 }
 0x436   : > { %1182 = shalt.err (!%p1179_p3)
}
 0x437   : > { %s1232_s17 = smov 128   ;;  %s1233_s20 = smov 8  }
 0x438   : > { %1027 = dma.vmem_to_hbm [thread:$0]  (%p1492_p1), %s1421_s14, 512, %s1426_s22, %s1430_s23, %s1232_s17, %s1232_s17, %s1233_s20  }
 0x439 PF: > { %p1044_p4 = scmp.ge.s32.totalorder %s1225_s27, 2  ;;  %s726_s21 = sand.u32 1, %s1213_s24  }
 0x43a   : > { %p1493_p7 = scmp.ne.s32.totalorder %s1484_s12, 0  ;;  %s727_s29 = scalar_lea.sflag [#allocation4], %s726_s21 }
 0x43c   : > { %p1037_p8 = pnand %p1044_p4, %p1493_p7 }
 0x43e   : > { %1208 = dma.done.wait (!%p1037_p8), %s727_s29, 512  }
 0x43f   : > { %1210 = vsyncadd (!%p1037_p8), %s727_s29, 4294966784  ;;  %s1494_s28 = sld [smem:[#allocation11_spill]]  ;;  %p19_p11 = scmp.ge.s32.totalorder %s1299_s30, 4  }
 0x440   : > { %s1495_s24 = smov %s1217_s25  ;;  %s1496_s25 = smov %s1221_s26 }
 0x441   : > { %s1498_s27 = smov %s1299_s30  ;;  %21 = sbr.rel (!%p19_p11) target bundleno = 5 (0x5), region = 92 }
 0x445   : > { %s1497_s26 = smov %s1494_s28 }
 0x448   :  { %732 = vsyncpa [#allocation3], 1 }
 0x449   :  { %734 = vsyncpa [#allocation3 + $0x1], 1 }
 0x44a   :  { %735 = vsyncpa [#allocation6], 1 }
 0x44b   :  { %736 = vsyncpa [#allocation4], 1 }
 0x44c   :  { %738 = vsyncpa [#allocation4 + $0x1], 1 }

</bundles_post_ra>
